<compile_context>
chip_gen: v6e
topology: v6e:2x2x1
jax: 0.10.0
libtpu: 0.0.40
codegen_flags: <defaults>
</compile_context>

<pallas_src>
import jax
import jax.numpy as jnp
from jax.experimental import pallas as pl
from jax.experimental.pallas import tpu as pltpu


def _round_up(x, m):
    return ((x + m - 1) // m) * m


def _rbf_kernel(coef_ref, x1_ref, x2t_ref, x2n_ref, out_ref):
    """One (row-tile, col-tile) grid step.

    coef_ref : SMEM scalar prefetch, shape (1,) f32  -- precomputed -0.5/ls^2
    x1_ref   : VMEM (tm, D)   centered x1 row tile
    x2t_ref  : VMEM (D, tn)   centered x2, pre-transposed (lane-dense)
    x2n_ref  : VMEM (1, tn)   precomputed ||x2||^2 row vector
    out_ref  : VMEM (tm, tn)  RBF covariance tile
    """
    x1 = x1_ref[...]
    # per-tile x1 norm stays in-kernel (depends on the row tile only)
    x1_norm = jnp.sum(x1 * x1, axis=-1, keepdims=True)                 # (tm, 1)
    cross = jnp.dot(x1, x2t_ref[...],
                    preferred_element_type=jnp.float32)                # (tm, tn)
    sq = jnp.maximum(x1_norm + x2n_ref[...] - 2.0 * cross, 0.0)        # clamp_min_(0)
    # single VPU multiply by coef; EUP does exp only
    out_ref[...] = jnp.exp(sq * coef_ref[0]).astype(out_ref.dtype)


@jax.jit
def _rbf_forward_impl(x1, x2, ls):
    x1 = x1.astype(jnp.float32)
    x2 = x2.astype(jnp.float32)

    n, d = x1.shape
    m = x2.shape[0]

    # adjustment = x1.mean(-2, keepdim=True); center both inputs (global
    # reduction over all of x1 -> must precede tiling; cheap glue).
    adjustment = jnp.mean(x1, axis=-2, keepdims=True)
    x1c = x1 - adjustment
    x2c = x2 - adjustment

    # Hoisted once (instead of per grid step): transpose + squared norm of x2.
    x2t = x2c.T                                                # (d, m)
    x2_sqnorm = jnp.sum(x2c * x2c, axis=-1)[None, :]           # (1, m)

    # Tile selection: large row tiles, 128-multiple column tiles.
    tm = min(512, _round_up(n, 8))
    tn = min(2048, _round_up(m, 128))
    n_pad = _round_up(n, tm)
    m_pad = _round_up(m, tn)

    x1p = jnp.pad(x1c, ((0, n_pad - n), (0, 0)))
    x2tp = jnp.pad(x2t, ((0, 0), (0, m_pad - m)))
    x2np = jnp.pad(x2_sqnorm, ((0, 0), (0, m_pad - m)))

    # Fold the lengthscale into one scalar multiplier: -0.5 / ls^2.
    coef = jnp.reshape(-0.5 / (ls.astype(jnp.float32) ** 2), (1,))

    grid = (n_pad // tm, m_pad // tn)

    out = pl.pallas_call(
        _rbf_kernel,
        out_shape=jax.ShapeDtypeStruct((n_pad, m_pad), jnp.float32),
        grid_spec=pltpu.PrefetchScalarGridSpec(
            num_scalar_prefetch=1,                      # coef -> SMEM
            grid=grid,
            in_specs=[
                pl.BlockSpec((tm, d), lambda i, j, coef: (i, 0)),   # x1 tile
                pl.BlockSpec((d, tn), lambda i, j, coef: (0, j)),   # x2^T tile
                pl.BlockSpec((1, tn), lambda i, j, coef: (0, j)),   # ||x2||^2 tile
            ],
            out_specs=pl.BlockSpec((tm, tn), lambda i, j, coef: (i, j)),
        ),
        compiler_params=pltpu.CompilerParams(
            dimension_semantics=("parallel", "parallel"),
            vmem_limit_bytes=48 * 1024 * 1024,
        ),
    )(coef, x1p, x2tp, x2np)

    return out[:n, :m]


def rbf_forward(x1, x2, ls):
    """RBFKernel.forward(x1, x2).  x2=None -> K(x1, x1)."""
    if x2 is None:
        x2 = x1
    return _rbf_forward_impl(x1, x2, ls)


def rbf_reference(x1, x2, ls):
    """Pure-JAX reference mirroring the torch code path."""
    if x2 is None:
        x2 = x1
    adjustment = jnp.mean(x1, axis=-2, keepdims=True)
    x1 = x1 - adjustment
    x2 = x2 - adjustment
    x1_norm = jnp.sum(x1 ** 2, axis=-1, keepdims=True)
    x2_norm = jnp.sum(x2 ** 2, axis=-1, keepdims=True)
    x1_ = jnp.concatenate([-2.0 * x1, x1_norm, jnp.ones_like(x1_norm)], axis=-1)
    x2_ = jnp.concatenate([x2, jnp.ones_like(x2_norm), x2_norm], axis=-1)
    res = jnp.maximum(x1_ @ x2_.T, 0.0)
    return jnp.exp(-0.5 * res / ls ** 2)


if __name__ == "__main__":
    key = jax.random.PRNGKey(0)
    k1, k2, k3, k4 = jax.random.split(key, 4)

    # register_buffer('ls', torch.ones(1)) -> default lengthscale = 1.0;
    # also exercise a non-unit lengthscale.
    ls_one = jnp.ones((1,), dtype=jnp.float32)
    ls_other = jnp.full((1,), 0.7, dtype=jnp.float32)

    # Case 1: aligned-ish small shapes.
    N, M, D = 64, 48, 8
    x1 = jax.random.normal(k1, (N, D), dtype=jnp.float32)
    x2 = jax.random.normal(k2, (M, D), dtype=jnp.float32)

    out_cross = jax.block_until_ready(rbf_forward(x1, x2, ls_one))
    out_self = jax.block_until_ready(rbf_forward(x1, None, ls_other))

    ref_cross = rbf_reference(x1, x2, ls_one[0])
    ref_self = rbf_reference(x1, None, ls_other[0])

    assert out_cross.shape == (N, M) and out_self.shape == (N, N)
    assert jnp.allclose(out_cross, ref_cross, atol=1e-5, rtol=1e-5)
    assert jnp.allclose(out_self, ref_self, atol=1e-5, rtol=1e-5)

    # Case 2: awkward (non-multiple) shapes to exercise the padding path.
    N2, M2, D2 = 37, 19, 5
    x1b = jax.random.normal(k3, (N2, D2), dtype=jnp.float32)
    x2b = jax.random.normal(k4, (M2, D2), dtype=jnp.float32)

    out_b = jax.block_until_ready(rbf_forward(x1b, x2b, ls_other))
    ref_b = rbf_reference(x1b, x2b, ls_other[0])

    assert out_b.shape == (N2, M2)
    assert jnp.allclose(out_b, ref_b, atol=1e-5, rtol=1e-5)

    # TODO(synk): get_median_ls / covar_dist (torch.median over a boolean mask)
    # are not part of forward() and are left unimplemented.
    print("KERNEL_OK")
</pallas_src>

<mosaic_0001>
module attributes {stable_mosaic.version = 11 : i64} {
  func.func @_rbf_kernel(%arg0: i32, %arg1: i32, %arg2: memref<1xf32, #tpu.memory_space<smem>>, %arg3: memref<64x8xf32, #tpu.memory_space<vmem>>, %arg4: memref<8x128xf32, #tpu.memory_space<vmem>>, %arg5: memref<1x128xf32, #tpu.memory_space<vmem>>, %arg6: memref<64x128xf32, #tpu.memory_space<vmem>>) attributes {dimension_semantics = [#tpu.dimension_semantics<parallel>, #tpu.dimension_semantics<parallel>], iteration_bounds = array<i64: 1, 1>, scalar_prefetch = 1 : i64, scratch_operands = 0 : i64, tpu.core_type = #tpu.core_type<tc>, window_params = [{transform_indices = @transform_0, window_bounds = array<i64: 64, 8>}, {transform_indices = @transform_1, window_bounds = array<i64: 8, 128>}, {transform_indices = @transform_2, window_bounds = array<i64: 1, 128>}, {transform_indices = @transform_3, window_bounds = array<i64: 64, 128>}]} {
    %c0 = arith.constant 0 : index
    %c0_0 = arith.constant 0 : index
    %0 = vector.load %arg3[%c0, %c0_0] : memref<64x8xf32, #tpu.memory_space<vmem>>, vector<64x8xf32>
    %1 = arith.mulf %0, %0 : vector<64x8xf32>
    %cst = arith.constant dense<0.000000e+00> : vector<64xf32>
    %2 = vector.multi_reduction <add>, %1, %cst [1] : vector<64x8xf32> to vector<64xf32>
    %3 = vector.shape_cast %2 : vector<64xf32> to vector<64x1xf32>
    %c0_1 = arith.constant 0 : index
    %c0_2 = arith.constant 0 : index
    %4 = vector.load %arg4[%c0_1, %c0_2] : memref<8x128xf32, #tpu.memory_space<vmem>>, vector<8x128xf32>
    %cst_3 = arith.constant dense<0.000000e+00> : vector<64x128xf32>
    %5 = tpu.matmul %0, %4, %cst_3 {dimension_numbers = #tpu.dot_dimension_numbers<[1], [0], [0], [1], [0, 0, 1, 1], [], []>} : vector<64x8xf32>, vector<8x128xf32>, vector<64x128xf32> -> vector<64x128xf32>
    %c0_4 = arith.constant 0 : index
    %c0_5 = arith.constant 0 : index
    %6 = vector.load %arg5[%c0_4, %c0_5] : memref<1x128xf32, #tpu.memory_space<vmem>>, vector<1x128xf32>
    %7 = vector.broadcast %3 : vector<64x1xf32> to vector<64x128xf32>
    %8 = vector.broadcast %6 : vector<1x128xf32> to vector<64x128xf32>
    %9 = arith.addf %7, %8 : vector<64x128xf32>
    %cst_6 = arith.constant 2.000000e+00 : f32
    %10 = vector.broadcast %cst_6 : f32 to vector<64x128xf32>
    %11 = arith.mulf %10, %5 : vector<64x128xf32>
    %12 = arith.subf %9, %11 : vector<64x128xf32>
    %cst_7 = arith.constant 0.000000e+00 : f32
    %13 = vector.broadcast %cst_7 : f32 to vector<64x128xf32>
    %14 = arith.maximumf %12, %13 : vector<64x128xf32>
    %c0_8 = arith.constant 0 : index
    %15 = memref.load %arg2[%c0_8] : memref<1xf32, #tpu.memory_space<smem>>
    %16 = vector.broadcast %15 : f32 to vector<64x128xf32>
    %17 = arith.mulf %14, %16 : vector<64x128xf32>
    %18 = math.exp %17 : vector<64x128xf32>
    %c0_9 = arith.constant 0 : index
    %c0_10 = arith.constant 0 : index
    %19 = vector.load %arg6[%c0_9, %c0_10] : memref<64x128xf32, #tpu.memory_space<vmem>>, vector<64x128xf32>
    tpu.vector_store %arg6[%c0_9, %c0_10], %18 {strides = array<i32>} : memref<64x128xf32, #tpu.memory_space<vmem>>, vector<64x128xf32>,
    return
  }
  func.func @transform_0(%arg0: i32, %arg1: i32, %arg2: memref<1xf32, #tpu.memory_space<smem>>) -> (i32, i32) {
    %c0_i32 = arith.constant 0 : i32
    %c0_i32_0 = arith.constant 0 : i32
    return %arg0, %c0_i32 : i32, i32
  }
  func.func @transform_1(%arg0: i32, %arg1: i32, %arg2: memref<1xf32, #tpu.memory_space<smem>>) -> (i32, i32) {
    %c0_i32 = arith.constant 0 : i32
    %c0_i32_0 = arith.constant 0 : i32
    return %c0_i32, %arg1 : i32, i32
  }
  func.func @transform_2(%arg0: i32, %arg1: i32, %arg2: memref<1xf32, #tpu.memory_space<smem>>) -> (i32, i32) {
    %c0_i32 = arith.constant 0 : i32
    %c0_i32_0 = arith.constant 0 : i32
    return %c0_i32, %arg1 : i32, i32
  }
  func.func @transform_3(%arg0: i32, %arg1: i32, %arg2: memref<1xf32, #tpu.memory_space<smem>>) -> (i32, i32) {
    %c0_i32 = arith.constant 0 : i32
    return %arg0, %arg1 : i32, i32
  }
}

</mosaic_0001>

<bundles_post_ra>
// kernel: _rbf_forward_impl.1
= control target key start
LH: loop header
LB: loop body
LE: loop exit
PB: predicated region body
PF: predicated region fallthrough
CT: control target
= control target key end

     0   :  { %vm32_vm0 = vcmask 64512   ;;  %s412_s2 = inlined_call_operand.vmem [shape: f32[8,128], index: 2, kind: input, shape index: {}]   ;;  %s413_s1 = inlined_call_operand.vmem [shape: f32[64,8], index: 1, kind: input, shape index: {}]   ;;  %s414_s3 = inlined_call_operand.vmem [shape: f32[1,128], index: 3, kind: input, shape index: {}]   ;;  %s415_s0 = inlined_call_operand.<no memory space> [shape: f32[1], index: 0, kind: input, shape index: {}]   ;;  %s416_s4 = inlined_call_operand.vmem [shape: f32[64,128], index: 4, kind: output, shape index: {}]  }
   0x1   :  { %v57_v0 = vld [vmem:[%s412_s2] sm:$0xff]  ;;  %v17_v4 = vld [vmem:[%s413_s1 + $0x8] sm:$0xff]  ;;  %v18_v6 = vld [vmem:[%s413_s1 + $0x10] sm:$0xff]  ;;  %v227_v49 = vstv %s415_s0 }
   0x2   :  { %v16_v1 = vld [vmem:[%s413_s1] sm:$0xff]  ;;  %282 = vmatprep.subr.mxu0 %v57_v0  ;;  %296 = vmatprep.subr.mxu1 %v57_v0  ;;  %v21_v5 = vld [vmem:[%s413_s1 + $0x28] sm:$0xff]  ;;  %v22_v7 = vld [vmem:[%s413_s1 + $0x30] sm:$0xff]  ;;  %v26_v9 = vmul.f32 %v18_v6, %v18_v6  ;;  %v25_v12 = vmul.f32 %v17_v4, %v17_v4 }
   0x3   :  { %v20_v2 = vld [vmem:[%s413_s1 + $0x20] sm:$0xff]  ;;  %v24_v3 = vmul.f32 %v16_v1, %v16_v1  ;;  %283 = vmatpush3.msra.mxu0 %v57_v0  ;;  %297 = vmatpush3.msra.mxu1 %v57_v0  ;;  %v19_v8 = vld [vmem:[%s413_s1 + $0x18] sm:$0xff]  ;;  %v29_v18 = vmul.f32 %v21_v5, %v21_v5  ;;  %v30_v22 = vmul.f32 %v22_v7, %v22_v7 }
   0x4   :  { %284 = vmatprep.mubr.msk.f32.mxu0 %vm32_vm0, %v16_v1  ;;  %290 = vmatprep.mubr.msk.f32.mxu1 %vm32_vm0, %v20_v2  ;;  %v27_v11 = vmul.f32 %v19_v8, %v19_v8  ;;  %v39_v13 = vsel %vm32_vm0, %v26_v9, 0.0  ;;  %v23_v14 = vld [vmem:[%s413_s1 + $0x38] sm:$0xff]  ;;  %v28_v15 = vmul.f32 %v20_v2, %v20_v2  ;;  %v36_v17 = vsel %vm32_vm0, %v25_v12, 0.0  ;;  %v272_v31 = vld [vmem:[%s414_s3] ss:$0 sm:$0xff] }
   0x5   :  { %v33_v10 = vsel %vm32_vm0, %v24_v3, 0.0  ;;  %285 = vmatmul.mubr.msk.f32.vlgmr.msra.gmra.mxu0 %vm32_vm0, %v17_v4  ;;  %291 = vmatmul.mubr.msk.f32.vlgmr.msra.gmra.mxu1 %vm32_vm0, %v21_v5  ;;  %v48_v19 = vsel %vm32_vm0, %v29_v18, 0.0  ;;  %v31_v21 = vmul.f32 %v23_v14, %v23_v14  ;;  %v51_v24 = vsel %vm32_vm0, %v30_v22, 0.0 }
   0x6   :  { %287 = vmatprep.mubr.msk.f32.mxu0 %vm32_vm0, %v18_v6  ;;  %293 = vmatprep.mubr.msk.f32.mxu1 %vm32_vm0, %v22_v7  ;;  %v42_v16 = vsel %vm32_vm0, %v27_v11, 0.0  ;;  %v45_v20 = vsel %vm32_vm0, %v28_v15, 0.0 }
   0x7   :  { %40 = vadd.xlane.f32.xlu1 %v39_v13  ;;  %34 = vadd.xlane.f32.xlu0 %v33_v10  ;;  %v54_v23 = vsel %vm32_vm0, %v31_v21, 0.0 }
   0x9   :  { %288 = vmatmul.mubr.msk.f32.gmra.mxu0 %vm32_vm0, %v19_v8  ;;  %294 = vmatmul.mubr.msk.f32.gmra.mxu1 %vm32_vm0, %v23_v14 }
   0xb   :  { %43 = vadd.xlane.f32.xlu1 %v42_v16  ;;  %37 = vadd.xlane.f32.xlu0 %v36_v17 }
   0xf   :  { %49 = vadd.xlane.f32.xlu1 %v48_v19  ;;  %46 = vadd.xlane.f32.xlu0 %v45_v20 }
  0x13   :  { %55 = vadd.xlane.f32.xlu1 %v54_v23  ;;  %52 = vadd.xlane.f32.xlu0 %v51_v24 }
  0x90   :  { %v41_v25 = vpop.xlane.xlu1 %40  ;;  %v35_v26 = vpop.xlane.xlu0 %34 }
  0x91   :  { %v194_v40 = vadd.f32 %v272_v31, %v35_v26  ;;  %v196_v48 = vadd.f32 %v272_v31, %v41_v25 }
  0x94   :  { %v44_v27 = vpop.xlane.xlu1 %43  ;;  %v38_v28 = vpop.xlane.xlu0 %37 }
  0x95   :  { %v195_v35 = vadd.f32 %v272_v31, %v38_v28  ;;  %v197_v57 = vadd.f32 %v272_v31, %v44_v27 }
  0x98   :  { %v50_v29 = vpop.xlane.xlu1 %49  ;;  %v47_v30 = vpop.xlane.xlu0 %46 }
  0x99   :  { %v199_v32 = vadd.f32 %v272_v31, %v50_v29  ;;  %v198_v38 = vadd.f32 %v272_v31, %v47_v30 }
  0x9c   :  { %v56_v39 = vpop.xlane.xlu1 %55  ;;  %v53_v47 = vpop.xlane.xlu0 %52 }
  0x9d   :  { %v201_v51 = vadd.f32 %v272_v31, %v56_v39  ;;  %v200_v62 = vadd.f32 %v272_v31, %v53_v47 }
  0xc5   :  { %v292_v33 = vpop.f32.mrf.mxu1  ;;  %v286_v34 = vpop.f32.mrf.mxu0 }
  0xc6   :  { %v207_v36 = vmul.f32 2.0, %v292_v33  ;;  %v203_v37 = vmul.f32 2.0, %v286_v34 }
  0xc7   :  { %v148_v41 = vpop.f32.mrf.mxu0  ;;  %v168_v42 = vpop.f32.mrf.mxu1 }
  0xc8   :  { %v215_v43 = vsub.f32 %v199_v32, %v207_v36  ;;  %v211_v44 = vsub.f32 %v195_v35, %v203_v37  ;;  %v202_v45 = vmul.f32 2.0, %v148_v41  ;;  %v206_v46 = vmul.f32 2.0, %v168_v42 }
  0xc9   :  { %v295_v50 = vpop.f32.mrf.mxu1  ;;  %v289_v52 = vpop.f32.mrf.mxu0 }
  0xca   :  { %v223_v53 = vmax.f32 %v215_v43, 0.0  ;;  %v219_v54 = vmax.f32 %v211_v44, 0.0  ;;  %v210_v55 = vsub.f32 %v194_v40, %v202_v45  ;;  %v214_v56 = vsub.f32 %v198_v38, %v206_v46 }
  0xcb   :  { %v209_v58 = vmul.f32 2.0, %v295_v50  ;;  %v205_v59 = vmul.f32 2.0, %v289_v52  ;;  %v158_v60 = vpop.f32.mrf.mxu0  ;;  %v178_v61 = vpop.f32.mrf.mxu1 }
  0xcc   :  { %v233_v63 = vmul.f32 %v227_v49, %v223_v53  ;;  %v229_v0 = vmul.f32 %v227_v49, %v219_v54  ;;  %v218_v1 = vmax.f32 %v210_v55, 0.0  ;;  %v222_v2 = vmax.f32 %v214_v56, 0.0 }
  0xcd   :  { %v217_v3 = vsub.f32 %v201_v51, %v209_v58  ;;  %v213_v4 = vsub.f32 %v197_v57, %v205_v59  ;;  %v204_v5 = vmul.f32 2.0, %v158_v60  ;;  %v208_v6 = vmul.f32 2.0, %v178_v61 }
  0xce   :  { %v246_v7 = vmul.f32 1.442695, %v233_v63  ;;  %v238_v8 = vmul.f32 1.442695, %v229_v0  ;;  %v228_v9 = vmul.f32 %v227_v49, %v218_v1  ;;  %v232_v10 = vmul.f32 %v227_v49, %v222_v2 }
  0xcf   :  { %v225_v11 = vmax.f32 %v217_v3, 0.0  ;;  %v221_v12 = vmax.f32 %v213_v4, 0.0  ;;  %v212_v13 = vsub.f32 %v196_v48, %v204_v5  ;;  %v216_v14 = vsub.f32 %v200_v62, %v208_v6 }
  0xd0   :  { %298 = vpow2.f32 %v246_v7  ;;  %v236_v15 = vmul.f32 1.442695, %v228_v9  ;;  %v244_v16 = vmul.f32 1.442695, %v232_v10 }
  0xd1   :  { %300 = vpow2.f32 %v238_v8  ;;  %v235_v17 = vmul.f32 %v227_v49, %v225_v11  ;;  %v231_v18 = vmul.f32 %v227_v49, %v221_v12  ;;  %v220_v19 = vmax.f32 %v212_v13, 0.0 }
  0xd2   :  { %302 = vpow2.f32 %v236_v15  ;;  %v224_v20 = vmax.f32 %v216_v14, 0.0 }
  0xd3   :  { %304 = vpow2.f32 %v244_v16  ;;  %v250_v21 = vmul.f32 1.442695, %v235_v17  ;;  %v242_v22 = vmul.f32 1.442695, %v231_v18  ;;  %v230_v23 = vmul.f32 %v227_v49, %v220_v19 }
  0xd4   :  { %v234_v24 = vmul.f32 %v227_v49, %v224_v20 }
  0xd5   :  { %306 = vpow2.f32 %v250_v21  ;;  %v240_v25 = vmul.f32 1.442695, %v230_v23 }
  0xd6   :  { %308 = vpow2.f32 %v242_v22  ;;  %v248_v26 = vmul.f32 1.442695, %v234_v24 }
  0xd7   :  { %310 = vpow2.f32 %v240_v25 }
  0xd8   :  { %312 = vpow2.f32 %v248_v26 }
  0xdd   :  { %v299_v27 = vpop.eup %298 }
  0xde   :  { %v301_v28 = vpop.eup %300  ;;  %257 = vst [vmem:[%s416_s4 + $0x28] sm:$0xff] %v299_v27 }
  0xdf   :  { %v303_v29 = vpop.eup %302  ;;  %253 = vst [vmem:[%s416_s4 + $0x8] sm:$0xff] %v301_v28 }
  0xe0   :  { %v305_v30 = vpop.eup %304  ;;  %252 = vst [vmem:[%s416_s4] sm:$0xff] %v303_v29 }
  0xe1   :  { %256 = vst [vmem:[%s416_s4 + $0x20] sm:$0xff] %v305_v30 }
  0xe2   :  { %v307_v31 = vpop.eup %306 }
  0xe3   :  { %v309_v32 = vpop.eup %308  ;;  %259 = vst [vmem:[%s416_s4 + $0x38] sm:$0xff] %v307_v31 }
  0xe4   :  { %v311_v33 = vpop.eup %310  ;;  %255 = vst [vmem:[%s416_s4 + $0x18] sm:$0xff] %v309_v32 }
  0xe5   :  { %v313_v34 = vpop.eup %312  ;;  %254 = vst [vmem:[%s416_s4 + $0x10] sm:$0xff] %v311_v33 }
  0xe6   :  { %258 = vst [vmem:[%s416_s4 + $0x30] sm:$0xff] %v313_v34 }

</bundles_post_ra>
